<compile_context>
chip_gen: v7x
topology: tpu7x:2x2x1
jax: 0.10.0
libtpu: 0.0.40
codegen_flags: <defaults>
</compile_context>

<pallas_src>
import functools

import jax
import jax.numpy as jnp
from jax import lax
from jax.experimental import pallas as pl
from jax.experimental.pallas import tpu as pltpu


# ---------------------------------------------------------------------------
# Kernel 1: hoisted projection (runs ONCE per layer, gridded over node tiles).
#   xh_t  [H*C, N] bf16 :  W^T x^T                (feeds the aggregation MXU op)
#   a_src [H,   N] f32  :  (W_h a_src_h)^T x^T    (source-side logits)
#   a_dst [H,   N] f32  :  (W_h a_dst_h)^T x^T    (destination-side logits)
# All outputs are lane-dense in the node axis.
# ---------------------------------------------------------------------------
def _gat_project_kernel(xt_ref, wt_ref, wasrc_ref, wadst_ref,
                        xht_ref, asrc_ref, adst_ref):
    xt_f32 = xt_ref[...].astype(jnp.float32)                 # [Fin, Tn]
    xht_ref[...] = jnp.dot(wt_ref[...], xt_f32.astype(jnp.bfloat16),
                           preferred_element_type=jnp.float32
                           ).astype(jnp.bfloat16)            # [H*C, Tn] bf16
    # Logit matmuls stay f32 (tiny M=H rows, hoisted -> negligible cost).
    asrc_ref[...] = jnp.dot(wasrc_ref[...], xt_f32,
                            preferred_element_type=jnp.float32)   # [H, Tn]
    adst_ref[...] = jnp.dot(wadst_ref[...], xt_f32,
                            preferred_element_type=jnp.float32)   # [H, Tn]


def gat_project(x_t, w_t_bf16, wasrc, wadst, *, heads, ch, block_n, vmem_limit):
    fin, n = x_t.shape
    fout = heads * ch
    tn = block_n
    return pl.pallas_call(
        _gat_project_kernel,
        out_shape=(jax.ShapeDtypeStruct((fout, n), jnp.bfloat16),
                   jax.ShapeDtypeStruct((heads, n), jnp.float32),
                   jax.ShapeDtypeStruct((heads, n), jnp.float32)),
        grid_spec=pltpu.PrefetchScalarGridSpec(
            num_scalar_prefetch=0,
            grid=(n // tn,),
            in_specs=[
                pl.BlockSpec((fin, tn), lambda i: (0, i)),     # x^T tile
                pl.BlockSpec((fout, fin), lambda i: (0, 0)),   # W^T (tiny)
                pl.BlockSpec((heads, fin), lambda i: (0, 0)),  # folded a_src
                pl.BlockSpec((heads, fin), lambda i: (0, 0)),  # folded a_dst
            ],
            out_specs=[
                pl.BlockSpec((fout, tn), lambda i: (0, i)),
                pl.BlockSpec((heads, tn), lambda i: (0, i)),
                pl.BlockSpec((heads, tn), lambda i: (0, i)),
            ]),
        compiler_params=pltpu.CompilerParams(
            dimension_semantics=("parallel",),
            vmem_limit_bytes=vmem_limit),
    )(x_t, w_t_bf16, wasrc, wadst)


# ---------------------------------------------------------------------------
# Kernel 2: attention + aggregation, grid = (dst_tiles, heads).
# Per (i, h): masked softmax over sources (lanes), then one lane-dense
# A @ B^T MXU aggregation producing agg^T [C, Tdst].
# ---------------------------------------------------------------------------
def _gat_attend_kernel(asrc_ref, adst_ref, xht_ref, bias_ref, adj_ref, out_ref,
                       *, heads, concat, apply_elu):
    # Logits for this (dst tile, head): e[d, s] = a_dst[d] + a_src[s]   (f32)
    e = adst_ref[0] + asrc_ref[0]                    # [Tdst,1]+[1,N] -> [Tdst,N]
    e = jnp.maximum(e, 0.2 * e)                      # LeakyReLU(0.2)
    # Additive "-inf" mask (f32-safe); self-loops guarantee non-empty rows.
    e = e + (adj_ref[...].astype(jnp.float32) - 1.0) * 1e30
    e = e - jnp.max(e, axis=1, keepdims=True)
    p = jnp.exp(e)                                   # masked entries -> exactly 0
    inv = pl.reciprocal(jnp.sum(p, axis=1, keepdims=True), approx=True)
    alpha = (p * inv).astype(jnp.bfloat16)           # [Tdst, N]
    # TODO(synk): attention dropout (dropout=drop_edge) is identity here
    # (eval mode / drop_edge=0); not implemented for drop_edge > 0.

    # Lane-dense aggregation (MXU, A @ B^T): agg_t[c, d] = sum_s xh[c,s]*alpha[d,s]
    agg_t = lax.dot_general(xht_ref[0], alpha, (((1,), (1,)), ((), ())),
                            preferred_element_type=jnp.float32)   # [C, Tdst]

    if concat:
        o = agg_t + bias_ref[0]                      # [C, Tdst] + [C, 1]
        if apply_elu:
            o = jnp.where(o > 0.0, o, jnp.exp(jnp.minimum(o, 0.0)) - 1.0)
        out_ref[0] = o.astype(out_ref.dtype)         # full-lane store
    else:
        h = pl.program_id(1)

        @pl.when(h == 0)
        def _():
            out_ref[...] = jnp.zeros_like(out_ref)

        out_ref[...] += agg_t                        # f32 accumulator (resident)

        @pl.when(h == heads - 1)
        def _():
            o = out_ref[...] * (1.0 / heads) + bias_ref[...]
            if apply_elu:
                o = jnp.where(o > 0.0, o, jnp.exp(jnp.minimum(o, 0.0)) - 1.0)
            out_ref[...] = o.astype(out_ref.dtype)


def gat_attend(a_src, a_dst, xh_t, bias, adj_i8, *, heads, ch, concat,
               apply_elu, block_dst, vmem_limit, out_dtype):
    n = adj_i8.shape[0]
    tdst = block_dst
    grid = (n // tdst, heads)                        # heads innermost

    # Metadata-only reshapes into Pallas-friendly layouts.
    a_src3 = a_src.reshape(heads, 1, n)              # per-head row  [1, N]
    a_dst3 = a_dst.reshape(heads, n, 1)              # per-head cols [N, 1]
    xh_t3 = xh_t.reshape(heads, ch, n)               # per-head      [C, N]

    if concat:
        bias3 = bias.reshape(heads, ch, 1)
        out_shape = jax.ShapeDtypeStruct((heads, ch, n), out_dtype)
        out_spec = pl.BlockSpec((1, ch, tdst), lambda i, h: (h, 0, i))
        bias_spec = pl.BlockSpec((1, ch, 1), lambda i, h: (h, 0, 0))
        dims = ("parallel", "parallel")
    else:
        bias3 = bias.reshape(ch, 1)
        out_shape = jax.ShapeDtypeStruct((ch, n), out_dtype)
        out_spec = pl.BlockSpec((ch, tdst), lambda i, h: (0, i))   # accumulator
        bias_spec = pl.BlockSpec((ch, 1), lambda i, h: (0, 0))
        dims = ("parallel", "arbitrary")

    kernel = functools.partial(_gat_attend_kernel, heads=heads, concat=concat,
                               apply_elu=apply_elu)
    return pl.pallas_call(
        kernel,
        out_shape=out_shape,
        grid_spec=pltpu.PrefetchScalarGridSpec(
            num_scalar_prefetch=0,
            grid=grid,
            in_specs=[
                pl.BlockSpec((1, 1, n), lambda i, h: (h, 0, 0)),     # a_src row
                pl.BlockSpec((1, tdst, 1), lambda i, h: (h, i, 0)),  # a_dst col
                pl.BlockSpec((1, ch, n), lambda i, h: (h, 0, 0)),    # xh_t head
                bias_spec,
                pl.BlockSpec((tdst, n), lambda i, h: (i, 0)),        # adj tile
            ],
            out_specs=out_spec),
        compiler_params=pltpu.CompilerParams(
            dimension_semantics=dims,
            vmem_limit_bytes=vmem_limit),
    )(a_src3, a_dst3, xh_t3, bias3, adj_i8)


# ---------------------------------------------------------------------------
# Layer / model wrappers.
# ---------------------------------------------------------------------------
def _pick_block_dst(n, requested=None, target=256):
    """Node tile (lane dim of every block -> multiple of 128 or full axis).
    Prefers an even number of >= 2 tiles so the 'parallel' axis splits evenly
    across v7x's two TensorCores."""
    cap = min(n, requested if requested is not None else target)
    cands = [t for t in range(128, cap + 1, 128) if n % t == 0]
    if not cands:
        return n
    even = [t for t in cands if (n // t) % 2 == 0]
    return max(even) if even else max(cands)


def gat_conv(x_t, w, att_src, att_dst, bias, adj_i8, *, heads, ch, concat,
             apply_elu=False, block_dst=None, vmem_limit=32 * 1024 * 1024,
             out_dtype=jnp.float32):
    """One GATConv layer (PyG semantics).  x_t is feature-major [Fin, N]."""
    fin, n = x_t.shape
    tdst = _pick_block_dst(n, block_dst)

    # Exact parameter folding: <W_h x, a> = x . (W_h a)  (layout plumbing).
    w_heads = w.reshape(fin, heads, ch)
    wasrc = jnp.einsum('fhc,hc->hf', w_heads, att_src)      # [H, Fin]
    wadst = jnp.einsum('fhc,hc->hf', w_heads, att_dst)      # [H, Fin]
    w_t = jnp.transpose(w).astype(jnp.bfloat16)             # [H*C, Fin]

    # Hoisted once-per-layer projection + attention-logit matmuls.
    xh_t, a_src, a_dst = gat_project(x_t, w_t, wasrc, wadst, heads=heads,
                                     ch=ch, block_n=tdst, vmem_limit=vmem_limit)
    # Attention + aggregation over (dst tile, head) grid.
    return gat_attend(a_src, a_dst, xh_t, bias, adj_i8, heads=heads, ch=ch,
                      concat=concat, apply_elu=apply_elu, block_dst=tdst,
                      vmem_limit=vmem_limit, out_dtype=out_dtype)


def dense_adj_with_self_loops(edge_index, num_nodes):
    """adj[i, j] = 1 iff edge j -> i (edge_index[0]=src, [1]=dst) + self-loops."""
    src, dst = edge_index[0], edge_index[1]
    adj = jnp.zeros((num_nodes, num_nodes), jnp.int8)
    adj = adj.at[dst, src].set(1)
    idx = jnp.arange(num_nodes)
    adj = adj.at[idx, idx].set(1)
    return adj


def init_gat_detector_params(key, in_dim, hidden_dim, out_dim, heads):
    c1 = hidden_dim            # per-head channels, layer 1 (concat=True)
    c2 = out_dim + 1           # per-head channels, layer 2 (concat=False)
    ks = jax.random.split(key, 8)
    nrm = jax.random.normal
    return {
        "w1":    nrm(ks[0], (in_dim, heads * c1), jnp.float32) * 0.3,
        "asrc1": nrm(ks[1], (heads, c1), jnp.float32) * 0.3,
        "adst1": nrm(ks[2], (heads, c1), jnp.float32) * 0.3,
        "b1":    nrm(ks[3], (heads * c1,), jnp.float32) * 0.1,
        "w2":    nrm(ks[4], (heads * c1, heads * c2), jnp.float32) * 0.1,
        "asrc2": nrm(ks[5], (heads, c2), jnp.float32) * 0.3,
        "adst2": nrm(ks[6], (heads, c2), jnp.float32) * 0.3,
        "b2":    nrm(ks[7], (c2,), jnp.float32) * 0.1,
    }


def gat_detector_forward(x, edge_index, params, *, heads, hidden_dim, out_dim,
                         block_dst=None, vmem_limit=32 * 1024 * 1024):
    """Eval-mode forward of GATDetector: returns (x1, x) like the torch module."""
    n = x.shape[0]
    adj = dense_adj_with_self_loops(edge_index, n)
    x_t = jnp.transpose(x)                                   # [Fin, N]
    # F.dropout(p=drop_prob) is identity in eval mode (drop_prob=0 default).
    h1 = gat_conv(x_t, params["w1"], params["asrc1"], params["adst1"],
                  params["b1"], adj, heads=heads, ch=hidden_dim, concat=True,
                  apply_elu=True, block_dst=block_dst, vmem_limit=vmem_limit,
                  out_dtype=jnp.bfloat16)                    # [H, C1, N] bf16
    x1_t = h1.reshape(heads * hidden_dim, n)                 # feeds layer 2 as-is
    out_t = gat_conv(x1_t, params["w2"], params["asrc2"], params["adst2"],
                     params["b2"], adj, heads=heads, ch=out_dim + 1,
                     concat=False, apply_elu=False, block_dst=block_dst,
                     vmem_limit=vmem_limit, out_dtype=jnp.float32)  # [C2, N]
    # Node-major user-facing outputs (wrapper layout plumbing only).
    x1 = jnp.transpose(x1_t).astype(jnp.float32)             # [N, H*C1]
    out = jnp.transpose(out_t)                               # [N, out_dim+1]
    return x1, out


def _reference_gat_conv(x, w, asrc, adst, bias, adj, heads, ch, concat, apply_elu):
    """Pure-JAX f32 reference (PyG GATConv semantics on a dense adjacency)."""
    n = x.shape[0]
    xh = (x @ w).reshape(n, heads, ch)
    a_s = jnp.einsum('nhc,hc->nh', xh, asrc)
    a_d = jnp.einsum('nhc,hc->nh', xh, adst)
    e = a_d[:, None, :] + a_s[None, :, :]
    e = jnp.where(e > 0, e, 0.2 * e)
    mask = (adj > 0)[:, :, None]
    e = jnp.where(mask, e, -jnp.inf)
    alpha = jax.nn.softmax(e, axis=1)
    out = jnp.einsum('dsh,shc->dhc', alpha, xh)
    if concat:
        out = out.reshape(n, heads * ch) + bias
    else:
        out = out.mean(axis=1) + bias
    if apply_elu:
        out = jnp.where(out > 0, out, jnp.exp(jnp.minimum(out, 0.0)) - 1.0)
    return out


if __name__ == "__main__":
    # Small deterministic problem: 2 destination tiles of 128 nodes each,
    # exercising the (dst_tile, head) grid and the layer-2 head accumulator.
    N, IN_DIM, HIDDEN, OUT_DIM, HEADS = 256, 16, 8, 3, 8

    key = jax.random.PRNGKey(0)
    k_x, k_p = jax.random.split(key)
    x = jax.random.normal(k_x, (N, IN_DIM), jnp.float32)

    # Bidirectional ring graph (no duplicate edges).
    idx = jnp.arange(N, dtype=jnp.int32)
    src = jnp.concatenate([idx, idx])
    dst = jnp.concatenate([(idx + 1) % N, (idx - 1) % N])
    edge_index = jnp.stack([src, dst], axis=0)               # [2, 2N]

    params = init_gat_detector_params(k_p, IN_DIM, HIDDEN, OUT_DIM, HEADS)

    x1, out = gat_detector_forward(x, edge_index, params, heads=HEADS,
                                   hidden_dim=HIDDEN, out_dim=OUT_DIM)
    jax.block_until_ready((x1, out))

    assert x1.shape == (N, HIDDEN * HEADS)
    assert out.shape == (N, OUT_DIM + 1)
    assert bool(jnp.all(jnp.isfinite(x1))) and bool(jnp.all(jnp.isfinite(out)))

    # Pure-JAX f32 reference check (loose tolerance: bf16 MXU, bf16 x1 handoff,
    # approx reciprocal).
    adj = dense_adj_with_self_loops(edge_index, N)
    r1 = _reference_gat_conv(x, params["w1"], params["asrc1"], params["adst1"],
                             params["b1"], adj, HEADS, HIDDEN, True, True)
    r2 = _reference_gat_conv(r1, params["w2"], params["asrc2"], params["adst2"],
                             params["b2"], adj, HEADS, OUT_DIM + 1, False, False)
    assert bool(jnp.allclose(x1, r1, rtol=0.1, atol=0.1))
    assert bool(jnp.allclose(out, r2, rtol=0.1, atol=0.1))
    print("KERNEL_OK")
</pallas_src>

<mosaic_0001>
module attributes {stable_mosaic.version = 11 : i64} {
  func.func @_gat_project_kernel(%arg0: i32, %arg1: memref<16x128xf32, #tpu.memory_space<vmem>>, %arg2: memref<64x16xbf16, #tpu.memory_space<vmem>>, %arg3: memref<8x16xf32, #tpu.memory_space<vmem>>, %arg4: memref<8x16xf32, #tpu.memory_space<vmem>>, %arg5: memref<64x128xbf16, #tpu.memory_space<vmem>>, %arg6: memref<8x128xf32, #tpu.memory_space<vmem>>, %arg7: memref<8x128xf32, #tpu.memory_space<vmem>>) attributes {dimension_semantics = [#tpu.dimension_semantics<parallel>], iteration_bounds = array<i64: 2>, scalar_prefetch = 0 : i64, scratch_operands = 0 : i64, tpu.core_type = #tpu.core_type<tc>, window_params = [{transform_indices = @transform_0, window_bounds = array<i64: 16, 128>}, {pipeline_mode = #tpu.pipeline_mode<synchronous>, transform_indices = @transform_1, window_bounds = array<i64: 64, 16>}, {pipeline_mode = #tpu.pipeline_mode<synchronous>, transform_indices = @transform_2, window_bounds = array<i64: 8, 16>}, {pipeline_mode = #tpu.pipeline_mode<synchronous>, transform_indices = @transform_3, window_bounds = array<i64: 8, 16>}, {transform_indices = @transform_4, window_bounds = array<i64: 64, 128>}, {transform_indices = @transform_5, window_bounds = array<i64: 8, 128>}, {transform_indices = @transform_6, window_bounds = array<i64: 8, 128>}]} {
    %c0 = arith.constant 0 : index
    %c0_0 = arith.constant 0 : index
    %0 = vector.load %arg1[%c0, %c0_0] : memref<16x128xf32, #tpu.memory_space<vmem>>, vector<16x128xf32>
    %c0_1 = arith.constant 0 : index
    %c0_2 = arith.constant 0 : index
    %1 = vector.load %arg2[%c0_1, %c0_2] : memref<64x16xbf16, #tpu.memory_space<vmem>>, vector<64x16xbf16>
    %2 = arith.truncf %0 : vector<16x128xf32> to vector<16x128xbf16>
    %cst = arith.constant dense<0.000000e+00> : vector<64x128xf32>
    %3 = tpu.matmul %1, %2, %cst {dimension_numbers = #tpu.dot_dimension_numbers<[1], [0], [0], [1], [0, 0, 1, 1], [], []>} : vector<64x16xbf16>, vector<16x128xbf16>, vector<64x128xf32> -> vector<64x128xf32>
    %4 = arith.truncf %3 : vector<64x128xf32> to vector<64x128xbf16>
    %c0_3 = arith.constant 0 : index
    %c0_4 = arith.constant 0 : index
    %5 = vector.load %arg5[%c0_3, %c0_4] : memref<64x128xbf16, #tpu.memory_space<vmem>>, vector<64x128xbf16>
    tpu.vector_store %arg5[%c0_3, %c0_4], %4 {strides = array<i32>} : memref<64x128xbf16, #tpu.memory_space<vmem>>, vector<64x128xbf16>,
    %c0_5 = arith.constant 0 : index
    %c0_6 = arith.constant 0 : index
    %6 = vector.load %arg3[%c0_5, %c0_6] : memref<8x16xf32, #tpu.memory_space<vmem>>, vector<8x16xf32>
    %cst_7 = arith.constant dense<0.000000e+00> : vector<8x128xf32>
    %7 = tpu.matmul %6, %0, %cst_7 {dimension_numbers = #tpu.dot_dimension_numbers<[1], [0], [0], [1], [0, 0, 1, 1], [], []>} : vector<8x16xf32>, vector<16x128xf32>, vector<8x128xf32> -> vector<8x128xf32>
    %c0_8 = arith.constant 0 : index
    %c0_9 = arith.constant 0 : index
    %8 = vector.load %arg6[%c0_8, %c0_9] : memref<8x128xf32, #tpu.memory_space<vmem>>, vector<8x128xf32>
    tpu.vector_store %arg6[%c0_8, %c0_9], %7 {strides = array<i32>} : memref<8x128xf32, #tpu.memory_space<vmem>>, vector<8x128xf32>,
    %c0_10 = arith.constant 0 : index
    %c0_11 = arith.constant 0 : index
    %9 = vector.load %arg4[%c0_10, %c0_11] : memref<8x16xf32, #tpu.memory_space<vmem>>, vector<8x16xf32>
    %cst_12 = arith.constant dense<0.000000e+00> : vector<8x128xf32>
    %10 = tpu.matmul %9, %0, %cst_12 {dimension_numbers = #tpu.dot_dimension_numbers<[1], [0], [0], [1], [0, 0, 1, 1], [], []>} : vector<8x16xf32>, vector<16x128xf32>, vector<8x128xf32> -> vector<8x128xf32>
    %c0_13 = arith.constant 0 : index
    %c0_14 = arith.constant 0 : index
    %11 = vector.load %arg7[%c0_13, %c0_14] : memref<8x128xf32, #tpu.memory_space<vmem>>, vector<8x128xf32>
    tpu.vector_store %arg7[%c0_13, %c0_14], %10 {strides = array<i32>} : memref<8x128xf32, #tpu.memory_space<vmem>>, vector<8x128xf32>,
    return
  }
  func.func @transform_0(%arg0: i32) -> (i32, i32) {
    %c0_i32 = arith.constant 0 : i32
    %c0_i32_0 = arith.constant 0 : i32
    return %c0_i32, %arg0 : i32, i32
  }
  func.func @transform_1(%arg0: i32) -> (i32, i32) {
    %c0_i32 = arith.constant 0 : i32
    %c0_i32_0 = arith.constant 0 : i32
    %c0_i32_1 = arith.constant 0 : i32
    return %c0_i32, %c0_i32_0 : i32, i32
  }
  func.func @transform_2(%arg0: i32) -> (i32, i32) {
    %c0_i32 = arith.constant 0 : i32
    %c0_i32_0 = arith.constant 0 : i32
    %c0_i32_1 = arith.constant 0 : i32
    return %c0_i32, %c0_i32_0 : i32, i32
  }
  func.func @transform_3(%arg0: i32) -> (i32, i32) {
    %c0_i32 = arith.constant 0 : i32
    %c0_i32_0 = arith.constant 0 : i32
    %c0_i32_1 = arith.constant 0 : i32
    return %c0_i32, %c0_i32_0 : i32, i32
  }
  func.func @transform_4(%arg0: i32) -> (i32, i32) {
    %c0_i32 = arith.constant 0 : i32
    %c0_i32_0 = arith.constant 0 : i32
    return %c0_i32, %arg0 : i32, i32
  }
  func.func @transform_5(%arg0: i32) -> (i32, i32) {
    %c0_i32 = arith.constant 0 : i32
    %c0_i32_0 = arith.constant 0 : i32
    return %c0_i32, %arg0 : i32, i32
  }
  func.func @transform_6(%arg0: i32) -> (i32, i32) {
    %c0_i32 = arith.constant 0 : i32
    %c0_i32_0 = arith.constant 0 : i32
    return %c0_i32, %arg0 : i32, i32
  }
}

</mosaic_0001>

<bundles_post_ra>
// kernel: tpu_custom_call.1
= control target key start
LH: loop header
LB: loop body
LE: loop exit
PB: predicated region body
PF: predicated region fallthrough
CT: control target
= control target key end

     0   :  { %12 = vsyncpa [#allocation4], 0  ;;  %s1344_s0 = inlined_call_operand.vmem [shape: f32[16,256], index: 0, kind: input, shape index: {}]   ;;  %s1345_s1 = inlined_call_operand.vmem [shape: bf16[64,16], index: 1, kind: input, shape index: {}]   ;;  %s1346_s2 = inlined_call_operand.vmem [shape: f32[8,16], index: 2, kind: input, shape index: {}]   ;;  %s1347_s3 = inlined_call_operand.vmem [shape: f32[8,16], index: 3, kind: input, shape index: {}]   ;;  %s1348_s4 = inlined_call_operand.hbm [shape: bf16[64,256], index: 4, kind: output, shape index: {0}]   ;;  %s1349_s5 = inlined_call_operand.hbm [shape: f32[8,256], index: 5, kind: output, shape index: {1}]   ;;  %s1350_s6 = inlined_call_operand.hbm [shape: f32[8,256], index: 6, kind: output, shape index: {2}]  }
   0x1   :  { %14 = vsyncpa [#allocation4 + $0x1], 0 }
   0x2   :  { %15 = vsyncpa [#allocation6], 0 }
   0x3   :  { %17 = vsyncpa [#allocation6 + $0x1], 0  ;;  %s1119_s21 = smov 0   ;;  %s1121_s22 = smov 0  }
   0x4   :  { %s1123_s23 = smov 0   ;;  %s1125_s24 = smov 0  }
   0x5 LB: > { %s1140_s25 = sadd.s32 4294967295, %s1073_s24   ;;  %s1351_s26 = sadd.s32 4294967294, %s1073_s24   ;;  %s1073_s24 = sphi %s1125_s24, %s1359_s24   ;;  %s1069_s23 = sphi %s1123_s23, %s1358_s23   ;;  %s1065_s22 = sphi %s1121_s22, %s1357_s22   ;;  %s1061_s21 = sphi %s1119_s21, %s1356_s21  }
   0x6   : > { %s1144_s27 = sadd.s32 1, %s1073_s24   ;;  %s30_s28 = sadd.s32 1, %s1069_s23 }
   0x7   : > { %s27_s29 = ssub.s32 %s1073_s24, %s1144_s27  ;;  %p37_p0 = scmp.ne.s32.totalorder %s1069_s23, %s1065_s22 }
   0x8   : > { %p28_p1 = scmp.eq.s32.totalorder %s27_s29, 0  ;;  %p38_p2 = scmp.eq.s32.totalorder %s1073_s24, 0 }
   0x9   : > { %p130_p3 = scmp.eq.s32.totalorder %s1140_s25, 1  ;;  %p135_p4 = scmp.ne.s32.totalorder %s1065_s22, %s1061_s21 }
   0xa   : > { %s1156_s30 = scalar_select %p28_p1, %s1069_s23, %s30_s28  }
   0xb   : > { %p39_p5 = por %p38_p2, %p37_p0  ;;  %p1158_p6 = por %p130_p3, %p37_p0 }
   0xc   : > { %p136_p7 = scmp.eq.s32.totalorder %s1351_s26, 1  ;;  %p786_p9 = scmp.ge.s32.totalorder %s1073_s24, 2 }
   0xe   : > { %p1164_p8 = por %p136_p7, %p135_p4  ;;  %213 = sbr.rel (%p786_p9) target bundleno = 28 (0x1c), region = 28 }
  0x15   : > { %216 = sbr.rel (!%p39_p5) target bundleno = 28 (0x1c), region = 32  ;;  %s218_s9 = sand.u32 (%p39_p5), 1, %s1069_s23  }
  0x16   : > { %s788_s10 = sshll.u32 (%p39_p5), %s1073_s24, 3  ;;  %s787_s11 = sshll.u32 (%p39_p5), %s218_s9, 4 }
  0x17   : > { %s222_s14 = scalar_lea.vmem (%p39_p5), %s1344_s0, %s788_s10  ;;  %s220_s15 = scalar_lea.vmem (%p39_p5), [#allocation2], %s787_s11 }
  0x18   : > { %v252_v0 = vld [vmem:[%s222_s14] sm:$0xff] (%p39_p5)  ;;  %v254_v1 = vld [vmem:[%s222_s14 + $0x10] sm:$0xff] (%p39_p5) }
  0x19   : > { %253 = vst [vmem:[%s220_s15] sm:$0xff] (%p39_p5), %v252_v0  ;;  %255 = vst [vmem:[%s220_s15 + $0x8] sm:$0xff] (%p39_p5), %v254_v1 }
  0x1c PF: > { %p789_p10 = scmp.ge.s32.totalorder %s1073_s24, 1  ;;  %p260_p11 = scmp.lt.s32.totalorder %s1073_s24, 3 }
  0x1e   : > { %p261_p12 = pnand %p789_p10, %p260_p11 }
  0x1f   : > { %s1179_s16 = sand.u32 (!%p261_p12), 1, %s1065_s22   ;;  %v947_v2 = vld [vmem:[%s1345_s1] sm:$0xff] (!%p261_p12)   ;;  %vm338_vm0 = vcmask (!%p261_p12), 130048   ;;  %v1075_v5 = vmov (!%p261_p12), 0.0|0.0   ;;  %vm1076_vm1 = vmmov (!%p261_p12), 0   ;;  %v1077_v7 = vmov (!%p261_p12), 0.0  }
  0x20   : > { %264 = sbr.rel (%p261_p12) target bundleno = 317 (0x13d), region = 70  ;;  %s790_s19 = sshll.u32 (!%p261_p12), %s1179_s16, 4  ;;  %864 = vmatprep.mubr.msk.bf16.mxu0 (!%p261_p12), %vm338_vm0, %v947_v2  ;;  %886 = vmatprep.subr.bf16.mxu1 (!%p261_p12), %v1075_v5  ;;  %v948_v8 = vld [vmem:[%s1345_s1 + $0x8] sm:$0xff] (!%p261_p12)   ;;  %v456_v9 = vld [vmem:[%s1346_s2] sm:$0xff] (!%p261_p12)  ;;  %v949_v10 = vld [vmem:[%s1345_s1 + $0x10] sm:$0xff] (!%p261_p12)  }
  0x21   : > { %s269_s20 = scalar_lea.vmem (!%p261_p12), [#allocation2], %s790_s19  ;;  %876 = vmatprep.mubr.msk.f32.mxu1 (!%p261_p12), %vm1076_vm1, %v1077_v7  ;;  %v531_v11 = vld [vmem:[%s1347_s3] sm:$0xff] (!%p261_p12)  ;;  %v950_v12 = vld [vmem:[%s1345_s1 + $0x18] sm:$0xff] (!%p261_p12)   ;;  %s792_s18 = sshll.u32 (!%p261_p12), %s1179_s16, 3 }
  0x22   : > { %v307_v3 = vld [vmem:[%s269_s20] sm:$0xff] (!%p261_p12)  ;;  %v308_v4 = vld [vmem:[%s269_s20 + $0x8] sm:$0xff] (!%p261_p12)  ;;  %s298_s19 = scalar_lea.vmem (!%p261_p12), [#allocation5], %s792_s18  ;;  %s611_s28 = sand.u32 (!%p261_p12), 1, %s1140_s25  }
  0x23   : > { %v317_v6 = vpack.c.bf16 (!%p261_p12), %v308_v4, %v307_v3  ;;  %s645_s20 = sshll.u32 (!%p261_p12), %s298_s19, 4  ;;  %s816_s29 = sshll.u32 (!%p261_p12), %s1140_s25, 7  ;;  %s1210_s20 = int_to_ptr.vmem [resolvable:$true] %s645_s20 }
  0x24   : > { %s1217_s12 = scalar_lea.hbm (!%p261_p12), %s1349_s5, %s816_s29  ;;  %s1219_s13 = scalar_lea.vmem (!%p261_p12), [#allocation7], %s792_s18 }
  0x25   : > { %862 = vmatprep.subr.bf16.mxu0 (!%p261_p12), %v317_v6  ;;  %888 = vmatpush3.bf16.msra.mxu1 (!%p261_p12), %v317_v6  ;;  %s658_s14 = sshll.u32 (!%p261_p12), %s1219_s13, 4  ;;  %s1224_s15 = scalar_lea.sflag (!%p261_p12), [#allocation6], %s611_s28  ;;  %s1250_s14 = int_to_ptr.vmem [resolvable:$true] %s658_s14 }
  0x26   : > { %863 = vmatpush3.bf16.msra.mxu0 (!%p261_p12), %v317_v6  ;;  %889 = vmatprep.subr.bf16.mxu1 (!%p261_p12), %v1075_v5  ;;  %s951_s17 = scalar_lea.vmem (!%p261_p12), %s1210_s20, 128  ;;  %s1078_s10 = smov (!%p261_p12), [#allocation5]  }
  0x27   : > { %p952_p13 = scmp.ne.s32.totalorder %s1210_s20, %s951_s17  ;;  %s955_s11 = sshll.u32 %s1078_s10, 4  ;;  %s956_s11 = int_to_ptr.vmem [resolvable:$false] %s955_s11 }
  0x28   : > { %877 = vmatmul.mubr.msk.f32.vlgmr.msra.gmra.mrb[0].mxu1 %vm338_vm0, %v456_v9  ;;  %s957_s26 = scalar_lea.vmem %s956_s11, 256  ;;  %p958_p2 = scmp.lt.s32.totalorder %s1210_s20, %s956_s11 }
  0x29   : > { %865 = vmatmul.mubr.msk.bf16.vlgmr.msra.gmra.mrb[0].mxu0 %vm338_vm0, %v948_v8  ;;  %891 = vmatpush3.bf16.msra.mxu1 %v317_v6  ;;  %p953_p0 = pnand %p952_p13, %p1158_p6  ;;  %p959_p3 = scmp.lt.s32.totalorder %s957_s26, %s951_s17 }
  0x2a   : > { %868 = vmatprep.mubr.msk.bf16.mxu0 %vm338_vm0, %v949_v10  ;;  %883 = vmatprep.mubr.msk.f32.mxu1 %vm1076_vm1, %v1077_v7 }
  0x2b   : > { %p954_p1 = pneg %p953_p0  ;;  %p960_p4 = por %p959_p3, %p958_p2 }
  0x2c   : > { %884 = vmatmul.mubr.msk.f32.vlgmr.msra.gmra.mrb[2].mxu1 %vm338_vm0, %v531_v11 }
  0x2d   : > { %p961_p5 = pnand %p960_p4, %p954_p1 }
  0x31   : > { %869 = vmatmul.mubr.msk.bf16.gmra.mrb[4].mxu0 %vm338_vm0, %v950_v12 }
  0xfb   : > { %v526_v13 = vpop.f32.mrb[0].mxu1 }
  0xfc   : > { %v866_v14 = vpop.f32.mrb[0].mxu0  ;;  %530 = vst [vmem:[%s298_s19] sm:$0xff] %v526_v13  ;;  %v878_v15 = vpop.f32.mrb[1].mxu1 }
  0xfd   : > { %v1222_v16 = vpop.f32.mrb[1].mxu0 }
  0xfe   : > { %964 = shalt.err (!%p961_p5)
}
  0xff   : > { %s965_s18 = scalar_lea.hbm %s1217_s12, 128  ;;  %s969_s10 = scalar_lea.hbm %s1349_s5, 256 }
 0x100   : > { %p966_p7 = scmp.ne.s32.totalorder %s1217_s12, %s965_s18  ;;  %p970_p12 = scmp.lt.u32.totalorder %s1217_s12, %s1349_s5 }
 0x101   : > { %p971_p13 = scmp.lt.u32.totalorder %s969_s10, %s965_s18  ;;  %p973_p1 = scmp.lt.u32.totalorder %s965_s18, %s1217_s12 }
 0x102   : > { %p967_p10 = pnand %p966_p7, %p1158_p6 }
 0x103   : > { %p972_p0 = por %p971_p13, %p970_p12 }
 0x104   : > { %p968_p11 = pneg %p967_p10 }
 0x105   : > { %p974_p2 = por %p973_p1, %p972_p0 }
 0x107   : > { %p975_p3 = pnand %p974_p2, %p968_p11 }
 0x109   : > { %978 = shalt.err (!%p975_p3)
}
 0x10a   : > { %893 = dma.vmem_to_hbm [thread:$0]  (%p1158_p6), %s1210_s20, 128, %s1217_s12, %s1224_s15   ;;  %v867_v17 = vpop.f32.mrb[2].mxu0  ;;  %v601_v20 = vpop.f32.mrb[2].mxu1 }
 0x10b   : > { %s1257_s17 = scalar_lea.hbm %s1350_s6, %s816_s29  ;;  %v836_v18 = vpack.c.bf16 %v867_v17, %v866_v14  ;;  %v388_v19 = vpop.f32.mrb[3].mxu0  ;;  %605 = vst [vmem:[%s1219_s13] sm:$0xff] %v601_v20  ;;  %v885_v22 = vpop.f32.mrb[3].mxu1  ;;  %s1354_s20 = sshll.u32 %s1179_s16, 5 }
 0x10c   : > { %v831_v21 = vpack.c.bf16 %v388_v19, %v1222_v16  ;;  %s1263_s12 = scalar_lea.vmem [#allocation3], %s1354_s20  ;;  %s979_s18 = scalar_lea.vmem %s1250_s14, 128 }
 0x10d   : > { %848 = vst [vmem:[%s1263_s12 + $0x8] sm:$0xff] %v836_v18   ;;  %p980_p4 = scmp.ne.s32.totalorder %s1250_s14, %s979_s18  ;;  %s1079_s29 = smov [#allocation7]  }
 0x10e   : > { %s983_s19 = sshll.u32 %s1079_s29, 4  ;;  %s984_s19 = int_to_ptr.vmem [resolvable:$false] %s983_s19 }
 0x10f   : > { %p981_p5 = pnand %p980_p4, %p1158_p6  ;;  %s985_s28 = scalar_lea.vmem %s984_s19, 256 }
 0x110   : > { %p986_p10 = scmp.lt.s32.totalorder %s1250_s14, %s984_s19  ;;  %p987_p11 = scmp.lt.s32.totalorder %s985_s28, %s979_s18 }
 0x111   : > { %p982_p7 = pneg %p981_p5 }
 0x112   : > { %p988_p12 = por %p987_p11, %p986_p10 }
 0x114   : > { %p989_p13 = pnand %p988_p12, %p982_p7 }
 0x116   : > { %992 = shalt.err (!%p989_p13)
}
 0x117   : > { %s993_s13 = scalar_lea.hbm %s1257_s17, 128  ;;  %s997_s26 = scalar_lea.hbm %s1350_s6, 256 }
 0x118   : > { %p994_p0 = scmp.ne.s32.totalorder %s1257_s17, %s993_s13  ;;  %p998_p3 = scmp.lt.u32.totalorder %s1257_s17, %s1350_s6 }
 0x119   : > { %p999_p4 = scmp.lt.u32.totalorder %s997_s26, %s993_s13  ;;  %p1001_p7 = scmp.lt.u32.totalorder %s993_s13, %s1257_s17 }
 0x11a   : > { %p995_p1 = pnand %p994_p0, %p1158_p6 }
 0x11b   : > { %p1000_p5 = por %p999_p4, %p998_p3 }
 0x11c   : > { %p996_p2 = pneg %p995_p1 }
 0x11d   : > { %p1002_p10 = por %p1001_p7, %p1000_p5 }
 0x11f   : > { %p1003_p11 = pnand %p1002_p10, %p996_p2 }
 0x121   : > { %1006 = shalt.err (!%p1003_p11)
}
 0x122   : > { %894 = dma.vmem_to_hbm [thread:$0]  (%p1158_p6), %s1250_s14, 128, %s1257_s17, %s1224_s15   ;;  %832 = vst [vmem:[%s1263_s12] sm:$0xff] %v831_v21   ;;  %v870_v23 = vpop.f32.mrb[4].mxu0 }
 0x123   : > { %s629_s18 = sshll.u32 %s1263_s12, 4  ;;  %s815_s29 = sshll.u32 %s1140_s25, 6  ;;  %v401_v24 = vpop.f32.mrb[5].mxu0  ;;  %s1291_s18 = int_to_ptr.vmem [resolvable:$true] %s629_s18 }
 0x124   : > { %v871_v25 = vpop.f32.mrb[6].mxu0  ;;  %s1296_s13 = scalar_lea.hbm %s1348_s4, %s815_s29  ;;  %s607_s14 = scalar_lea.sflag [#allocation4], %s1179_s16 }
 0x125   : > { %v846_v26 = vpack.c.bf16 %v871_v25, %v870_v23  ;;  %v404_v27 = vpop.f32.mrb[7].mxu0  ;;  %s1007_s15 = scalar_lea.vmem %s1291_s18, 512  ;;  %s1080_s25 = smov [#allocation3]  }
 0x126   : > { %v841_v28 = vpack.c.bf16 %v404_v27, %v401_v24  ;;  %p1008_p12 = scmp.ne.s32.totalorder %s1291_s18, %s1007_s15  ;;  %s1011_s17 = sshll.u32 %s1080_s25, 4  ;;  %s1012_s17 = int_to_ptr.vmem [resolvable:$false] %s1011_s17 }
 0x127   : > { %850 = vst [vmem:[%s1263_s12 + $0x18] sm:$0xff] %v846_v26   ;;  %s1013_s10 = scalar_lea.vmem %s1012_s17, 1024  ;;  %p1014_p1 = scmp.lt.s32.totalorder %s1291_s18, %s1012_s17 }
 0x128   : > { %849 = vst [vmem:[%s1263_s12 + $0x10] sm:$0xff] %v841_v28   ;;  %p1009_p13 = pnand %p1008_p12, %p1158_p6  ;;  %p1015_p2 = scmp.lt.s32.totalorder %s1013_s10, %s1007_s15 }
 0x12a   : > { %p1010_p0 = pneg %p1009_p13  ;;  %p1016_p3 = por %p1015_p2, %p1014_p1 }
 0x12c   : > { %p1017_p4 = pnand %p1016_p3, %p1010_p0 }
 0x12e   : > { %1020 = shalt.err (!%p1017_p4)
}
 0x12f   : > { %s1021_s12 = scalar_lea.hbm %s1296_s13, 512  ;;  %s1025_s9 = scalar_lea.hbm %s1348_s4, 1024 }
 0x130   : > { %p1022_p5 = scmp.ne.s32.totalorder %s1296_s13, %s1021_s12  ;;  %p1026_p11 = scmp.lt.u32.totalorder %s1296_s13, %s1348_s4 }
 0x131   : > { %p1027_p12 = scmp.lt.u32.totalorder %s1025_s9, %s1021_s12  ;;  %p1029_p0 = scmp.lt.u32.totalorder %s1021_s12, %s1296_s13 }
 0x132   : > { %p1023_p7 = pnand %p1022_p5, %p1158_p6 }
 0x133   : > { %p1028_p13 = por %p1027_p12, %p1026_p11 }
 0x134   : > { %p1024_p10 = pneg %p1023_p7 }
 0x135   : > { %p1030_p1 = por %p1029_p0, %p1028_p13 }
 0x137   : > { %p1031_p2 = pnand %p1030_p1, %p1024_p10 }
 0x139   : > { %1034 = shalt.err (!%p1031_p2)
}
 0x13a   : > { %s1081_s19 = smov 64   ;;  %s1082_s28 = smov 128  }
 0x13b   : > { %s1083_s15 = smov 4  }
 0x13c   : > { %892 = dma.vmem_to_hbm [thread:$0]  (%p1158_p6), %s1291_s18, 512, %s1296_s13, %s607_s14, %s1081_s19, %s1082_s28, %s1083_s15  }
 0x13d PF: > { %s670_s25 = sand.u32 1, %s1061_s21   ;;  %p899_p3 = pnand %p786_p9, %p1164_p8 }
 0x13e   : > { %s671_s17 = scalar_lea.sflag [#allocation4], %s670_s25 }
 0x13f   : > { %1052 = dma.done.wait (!%p899_p3), %s671_s17, 512  }
 0x140   : > { %1054 = vsyncadd (!%p899_p3), %s671_s17, 4294966784  ;;  %s1355_s10 = sadd.s32 4294967294, %s1073_s24  }
 0x141   : > { %s679_s12 = sand.u32 1, %s1355_s10  }
 0x142   : > { %s680_s11 = scalar_lea.sflag [#allocation6], %s679_s12 }
 0x143   : > { %1056 = dma.done.wait (!%p899_p3), %s680_s11, 256  }
 0x144   : > { %1058 = vsyncadd (!%p899_p3), %s680_s11, 4294967040  ;;  %p20_p6 = scmp.ge.s32.totalorder %s1144_s27, 4   ;;  %s1356_s21 = smov %s1065_s22 }
 0x145   : > { %s1357_s22 = smov %s1069_s23  ;;  %s1358_s23 = smov %s1156_s30 }
 0x146   : > { %s1359_s24 = smov %s1144_s27  ;;  %22 = sbr.rel (!%p20_p6) target bundleno = 5 (0x5), region = 146 }
 0x14d   :  { %694 = vsyncpa [#allocation4], 1 }
 0x14e   :  { %696 = vsyncpa [#allocation4 + $0x1], 1 }
 0x14f   :  { %697 = vsyncpa [#allocation6], 1 }
 0x150   :  { %699 = vsyncpa [#allocation6 + $0x1], 1 }

</bundles_post_ra>
